<compile_context>
chip_gen: v7x
topology: tpu7x:2x2x1
jax: 0.10.0
libtpu: 0.0.40
codegen_flags: <defaults>
</compile_context>

<pallas_src>
import functools

import jax
import jax.numpy as jnp
from jax.experimental import pallas as pl
from jax.experimental.pallas import tpu as pltpu


def _structural_kd_kernel(s_ref, t_ref, psum_ref, *, true_h, true_w, tile_h):
    pid = pl.program_id(0)
    s = s_ref[...].astype(jnp.float32)   # cast after load; inputs stream native dtype
    t = t_ref[...].astype(jnp.float32)
    _, _, th, w = s.shape                # (B, C, Th, W) block

    # Cheap 2-D index helpers (broadcast later) instead of full 4-D iotas.
    row_l = jax.lax.broadcasted_iota(jnp.int32, (th, w), 0)   # local row in tile
    col = jax.lax.broadcasted_iota(jnp.int32, (th, w), 1)
    row_g = row_l + pid * tile_h                              # global row

    # ceil_mode handling: guards only materialized when they can matter
    # (static decisions -- true_h / true_w / tile_h are Python ints).
    w_ok = ((col + 1) < true_w)[None, None] if (true_w % 2) else None
    need_h_guard = (true_h % 2 != 0) or (true_h % tile_h != 0)
    h_ok = ((row_g + 1) < true_h)[None, None] if need_h_guard else None

    def pool_and_normalize(x):
        # 2x2 / stride-2 max-pool value materialized at every position; only
        # even (row, col) positions are real pooled outputs (selected below).
        xr = jnp.roll(x, -1, axis=3)            # W-pair partner
        mx = jnp.maximum(x, xr)
        if w_ok is not None:                    # odd W: last col has no partner
            mx = jnp.where(w_ok, mx, x)
        mr = jnp.roll(mx, -1, axis=2)           # H-pair partner (within the tile,
        m2 = jnp.maximum(mx, mr)                #  since tile_h is even)
        if h_ok is not None:                    # odd / partial last rows
            m2 = jnp.where(h_ok, m2, mx)
        # torch F.normalize(p=2, dim=1, eps=1e-12) == x * rsqrt(max(|x|^2, eps^2))
        ss = jnp.sum(m2 * m2, axis=1, keepdims=True)
        return m2 * jax.lax.rsqrt(jnp.maximum(ss, jnp.float32(1e-24)))

    d = pool_and_normalize(s) - pool_and_normalize(t)

    keep = ((row_l & 1) == 0) & ((col & 1) == 0)
    if (true_h % tile_h) != 0:                  # mask garbage rows of a partial
        keep = keep & (row_g < true_h)          # last block
    # jnp.where is a select: any inf/NaN at masked (odd / out-of-range)
    # positions cannot leak into the sum (do NOT replace with a mask-multiply).
    err = jnp.where(keep[None, None], d * d, jnp.float32(0.0))
    psum_ref[pid] = jnp.sum(err)


def _auto_tile_h(B, C, H, W, itemsize, target_block_bytes=1 << 20):
    """Largest 8-aligned (hence even) H-tile keeping one input block <= ~1 MiB."""
    row_bytes = max(B * C * W * itemsize, 1)
    th = (target_block_bytes // row_bytes) // 8 * 8
    th = max(int(th), 8)
    if th >= H:
        return H                 # whole H in one block (any H allowed when full-dim)
    return th


def criterion_structural_kd(feat_S, feat_T, *, tile_h=None):
    """Pallas implementation of CriterionStructuralKD.forward. Returns a scalar."""
    assert feat_S.shape == feat_T.shape, "student/teacher shapes must match"
    B, C, H, W = feat_S.shape
    itemsize = jnp.dtype(feat_S.dtype).itemsize

    if tile_h is None:
        tile_h = _auto_tile_h(B, C, H, W, itemsize)
    tile_h = min(tile_h, H)
    # Pool windows start at even rows; the (8,128) sublane rule requires the
    # H-block to be a multiple of 8 (or the full H).
    assert tile_h == H or (tile_h % 8 == 0), "tile_h must be a multiple of 8 or H"
    n_blocks = pl.cdiv(H, tile_h)

    kernel = functools.partial(
        _structural_kd_kernel, true_h=H, true_w=W, tile_h=tile_h
    )

    partial_sums = pl.pallas_call(
        kernel,
        out_shape=jax.ShapeDtypeStruct((n_blocks,), jnp.float32),
        grid=(n_blocks,),
        in_specs=[
            pl.BlockSpec((B, C, tile_h, W), lambda i: (0, 0, i, 0)),
            pl.BlockSpec((B, C, tile_h, W), lambda i: (0, 0, i, 0)),
        ],
        out_specs=pl.BlockSpec(memory_space=pltpu.SMEM),
        compiler_params=pltpu.CompilerParams(
            dimension_semantics=("arbitrary",),
            vmem_limit_bytes=32 * 1024 * 1024,
        ),
    )(feat_S, feat_T)

    denom = jnp.float32(B * C * ((H + 1) // 2) * ((W + 1) // 2))
    return jnp.sum(partial_sums) / denom


def _reference(feat_S, feat_T):
    """Plain-JAX reference mirroring the PyTorch forward (ceil_mode pooling)."""
    def prep(x):
        x = x.astype(jnp.float32)
        B, C, H, W = x.shape
        Hp, Wp = ((H + 1) // 2) * 2, ((W + 1) // 2) * 2
        x = jnp.pad(x, ((0, 0), (0, 0), (0, Hp - H), (0, Wp - W)),
                    constant_values=-jnp.inf)
        p = x.reshape(B, C, Hp // 2, 2, Wp // 2, 2).max(axis=(3, 5))
        n = jnp.sqrt(jnp.sum(p * p, axis=1, keepdims=True))
        return p / jnp.maximum(n, 1e-12)
    return jnp.mean((prep(feat_S) - prep(feat_T)) ** 2)


def _check(res, ref, name):
    res, ref = float(res), float(ref)
    assert jnp.isfinite(res), f"{name}: non-finite result"
    assert abs(res - ref) < 1e-5 + 1e-4 * abs(ref), f"{name}: kernel={res} ref={ref}"


if __name__ == "__main__":
    key = jax.random.PRNGKey(0)
    k1, k2, k3, k4, k5, k6 = jax.random.split(key, 6)

    # Primary small shape (B, C, H, W) = (2, 4, 16, 16); tile_h=8 -> 2 grid steps.
    s32 = jax.random.normal(k1, (2, 4, 16, 16), dtype=jnp.float32)
    t32 = jax.random.normal(k2, (2, 4, 16, 16), dtype=jnp.float32)
    res = jax.block_until_ready(criterion_structural_kd(s32, t32, tile_h=8))
    _check(res, _reference(s32, t32), "f32 16x16")

    # bf16 inputs stream as bf16 (half the HBM bytes) and are cast in-kernel.
    s16, t16 = s32.astype(jnp.bfloat16), t32.astype(jnp.bfloat16)
    res_bf16 = jax.block_until_ready(criterion_structural_kd(s16, t16, tile_h=8))
    _check(res_bf16, _reference(s16, t16), "bf16 16x16")

    # Odd spatial dims exercise the in-kernel ceil_mode handling (no -inf pre-pad).
    s_odd = jax.random.normal(k3, (2, 4, 15, 15), dtype=jnp.float32)
    t_odd = jax.random.normal(k4, (2, 4, 15, 15), dtype=jnp.float32)
    res_odd = jax.block_until_ready(criterion_structural_kd(s_odd, t_odd))
    _check(res_odd, _reference(s_odd, t_odd), "f32 15x15 (ceil_mode)")

    # H not divisible by tile_h exercises the partial-last-block masking path.
    s_p = jax.random.normal(k5, (2, 4, 24, 16), dtype=jnp.float32)
    t_p = jax.random.normal(k6, (2, 4, 24, 16), dtype=jnp.float32)
    res_p = jax.block_until_ready(criterion_structural_kd(s_p, t_p, tile_h=16))
    _check(res_p, _reference(s_p, t_p), "f32 24x16 (partial last block)")

    print("KERNEL_OK")
</pallas_src>

<mosaic_0001>
module attributes {stable_mosaic.version = 11 : i64} {
  func.func @_structural_kd_kernel(%arg0: i32, %arg1: memref<2x4x8x16xf32, #tpu.memory_space<vmem>>, %arg2: memref<2x4x8x16xf32, #tpu.memory_space<vmem>>, %arg3: memref<2xf32, #tpu.memory_space<smem>>) attributes {dimension_semantics = [#tpu.dimension_semantics<arbitrary>], iteration_bounds = array<i64: 2>, scalar_prefetch = 0 : i64, scratch_operands = 0 : i64, tpu.core_type = #tpu.core_type<tc>, window_params = [{transform_indices = @transform_0, window_bounds = array<i64: 2, 4, 8, 16>}, {transform_indices = @transform_1, window_bounds = array<i64: 2, 4, 8, 16>}, {transform_indices = @transform_2, window_bounds = array<i64: 2>}]} {
    %c0 = arith.constant 0 : index
    %c0_0 = arith.constant 0 : index
    %c0_1 = arith.constant 0 : index
    %c0_2 = arith.constant 0 : index
    %0 = vector.load %arg1[%c0, %c0_0, %c0_1, %c0_2] : memref<2x4x8x16xf32, #tpu.memory_space<vmem>>, vector<2x4x8x16xf32>
    %c0_3 = arith.constant 0 : index
    %c0_4 = arith.constant 0 : index
    %c0_5 = arith.constant 0 : index
    %c0_6 = arith.constant 0 : index
    %1 = vector.load %arg2[%c0_3, %c0_4, %c0_5, %c0_6] : memref<2x4x8x16xf32, #tpu.memory_space<vmem>>, vector<2x4x8x16xf32>
    %2 = tpu.iota {dimensions = array<i32: 0>} : vector<8x16xi32>
    %3 = tpu.iota {dimensions = array<i32: 1>} : vector<8x16xi32>
    %4 = vector.extract_strided_slice %0 {offsets = [0, 0, 0, 1], sizes = [2, 4, 8, 15], strides = [1, 1, 1, 1]} : vector<2x4x8x16xf32> to vector<2x4x8x15xf32>
    %5 = vector.extract_strided_slice %0 {offsets = [0, 0, 0, 0], sizes = [2, 4, 8, 1], strides = [1, 1, 1, 1]} : vector<2x4x8x16xf32> to vector<2x4x8x1xf32>
    %6 = tpu.concatenate %4, %5 in 3 : vector<2x4x8x15xf32>, vector<2x4x8x1xf32> -> vector<2x4x8x16xf32>
    %7 = arith.maximumf %0, %6 : vector<2x4x8x16xf32>
    %8 = vector.extract_strided_slice %7 {offsets = [0, 0, 1, 0], sizes = [2, 4, 7, 16], strides = [1, 1, 1, 1]} : vector<2x4x8x16xf32> to vector<2x4x7x16xf32>
    %9 = vector.extract_strided_slice %7 {offsets = [0, 0, 0, 0], sizes = [2, 4, 1, 16], strides = [1, 1, 1, 1]} : vector<2x4x8x16xf32> to vector<2x4x1x16xf32>
    %10 = tpu.concatenate %8, %9 in 2 : vector<2x4x7x16xf32>, vector<2x4x1x16xf32> -> vector<2x4x8x16xf32>
    %11 = arith.maximumf %7, %10 : vector<2x4x8x16xf32>
    %12 = arith.mulf %11, %11 : vector<2x4x8x16xf32>
    %cst = arith.constant dense<0.000000e+00> : vector<2x8x16xf32>
    %13 = vector.multi_reduction <add>, %12, %cst [1] : vector<2x4x8x16xf32> to vector<2x8x16xf32>
    %14 = vector.shape_cast %13 : vector<2x8x16xf32> to vector<2x1x8x16xf32>
    %cst_7 = arith.constant 1.000000e-24 : f32
    %15 = vector.broadcast %cst_7 : f32 to vector<2x1x8x16xf32>
    %16 = arith.maximumf %14, %15 : vector<2x1x8x16xf32>
    %17 = math.rsqrt %16 : vector<2x1x8x16xf32>
    %18 = vector.broadcast %17 : vector<2x1x8x16xf32> to vector<2x4x8x16xf32>
    %19 = arith.mulf %11, %18 : vector<2x4x8x16xf32>
    %20 = vector.extract_strided_slice %1 {offsets = [0, 0, 0, 1], sizes = [2, 4, 8, 15], strides = [1, 1, 1, 1]} : vector<2x4x8x16xf32> to vector<2x4x8x15xf32>
    %21 = vector.extract_strided_slice %1 {offsets = [0, 0, 0, 0], sizes = [2, 4, 8, 1], strides = [1, 1, 1, 1]} : vector<2x4x8x16xf32> to vector<2x4x8x1xf32>
    %22 = tpu.concatenate %20, %21 in 3 : vector<2x4x8x15xf32>, vector<2x4x8x1xf32> -> vector<2x4x8x16xf32>
    %23 = arith.maximumf %1, %22 : vector<2x4x8x16xf32>
    %24 = vector.extract_strided_slice %23 {offsets = [0, 0, 1, 0], sizes = [2, 4, 7, 16], strides = [1, 1, 1, 1]} : vector<2x4x8x16xf32> to vector<2x4x7x16xf32>
    %25 = vector.extract_strided_slice %23 {offsets = [0, 0, 0, 0], sizes = [2, 4, 1, 16], strides = [1, 1, 1, 1]} : vector<2x4x8x16xf32> to vector<2x4x1x16xf32>
    %26 = tpu.concatenate %24, %25 in 2 : vector<2x4x7x16xf32>, vector<2x4x1x16xf32> -> vector<2x4x8x16xf32>
    %27 = arith.maximumf %23, %26 : vector<2x4x8x16xf32>
    %28 = arith.mulf %27, %27 : vector<2x4x8x16xf32>
    %cst_8 = arith.constant dense<0.000000e+00> : vector<2x8x16xf32>
    %29 = vector.multi_reduction <add>, %28, %cst_8 [1] : vector<2x4x8x16xf32> to vector<2x8x16xf32>
    %30 = vector.shape_cast %29 : vector<2x8x16xf32> to vector<2x1x8x16xf32>
    %cst_9 = arith.constant 1.000000e-24 : f32
    %31 = vector.broadcast %cst_9 : f32 to vector<2x1x8x16xf32>
    %32 = arith.maximumf %30, %31 : vector<2x1x8x16xf32>
    %33 = math.rsqrt %32 : vector<2x1x8x16xf32>
    %34 = vector.broadcast %33 : vector<2x1x8x16xf32> to vector<2x4x8x16xf32>
    %35 = arith.mulf %27, %34 : vector<2x4x8x16xf32>
    %36 = arith.subf %19, %35 : vector<2x4x8x16xf32>
    %c1_i32 = arith.constant 1 : i32
    %37 = vector.broadcast %c1_i32 : i32 to vector<8x16xi32>
    %38 = arith.andi %2, %37 : vector<8x16xi32>
    %c0_i32 = arith.constant 0 : i32
    %39 = vector.broadcast %c0_i32 : i32 to vector<8x16xi32>
    %40 = arith.cmpi eq, %38, %39 : vector<8x16xi32>
    %c1_i32_10 = arith.constant 1 : i32
    %41 = vector.broadcast %c1_i32_10 : i32 to vector<8x16xi32>
    %42 = arith.andi %3, %41 : vector<8x16xi32>
    %c0_i32_11 = arith.constant 0 : i32
    %43 = vector.broadcast %c0_i32_11 : i32 to vector<8x16xi32>
    %44 = arith.cmpi eq, %42, %43 : vector<8x16xi32>
    %45 = arith.andi %40, %44 : vector<8x16xi1>
    %46 = vector.shape_cast %45 : vector<8x16xi1> to vector<1x1x8x16xi1>
    %47 = arith.mulf %36, %36 : vector<2x4x8x16xf32>
    %cst_12 = arith.constant 0.000000e+00 : f32
    %48 = vector.shape_cast %46 : vector<1x1x8x16xi1> to vector<1x1x8x16xi1>
    %49 = vector.broadcast %48 : vector<1x1x8x16xi1> to vector<2x4x8x16xi1>
    %50 = vector.broadcast %cst_12 : f32 to vector<2x4x8x16xf32>
    %51 = arith.select %49, %47, %50 : vector<2x4x8x16xi1>, vector<2x4x8x16xf32>
    %52 = vector.shape_cast %51 : vector<2x4x8x16xf32> to vector<1x2x4x8x16xf32>
    %cst_13 = arith.constant dense<0.000000e+00> : vector<1xf32>
    %53 = vector.multi_reduction <add>, %52, %cst_13 [1, 2, 3, 4] : vector<1x2x4x8x16xf32> to vector<1xf32>
    %54 = vector.shape_cast %53 : vector<1xf32> to vector<1x1x1x1x1xf32>
    %55 = vector.extract %54[0, 0, 0, 0, 0] : f32 from vector<1x1x1x1x1xf32>
    %56 = arith.index_cast %arg0 : i32 to index
    %57 = memref.load %arg3[%56] : memref<2xf32, #tpu.memory_space<smem>>
    memref.store %55, %arg3[%56] : memref<2xf32, #tpu.memory_space<smem>>
    return
  }
  func.func @transform_0(%arg0: i32) -> (i32, i32, i32, i32) {
    %c0_i32 = arith.constant 0 : i32
    %c0_i32_0 = arith.constant 0 : i32
    %c0_i32_1 = arith.constant 0 : i32
    %c0_i32_2 = arith.constant 0 : i32
    return %c0_i32, %c0_i32_0, %arg0, %c0_i32_1 : i32, i32, i32, i32
  }
  func.func @transform_1(%arg0: i32) -> (i32, i32, i32, i32) {
    %c0_i32 = arith.constant 0 : i32
    %c0_i32_0 = arith.constant 0 : i32
    %c0_i32_1 = arith.constant 0 : i32
    %c0_i32_2 = arith.constant 0 : i32
    return %c0_i32, %c0_i32_0, %arg0, %c0_i32_1 : i32, i32, i32, i32
  }
  func.func @transform_2(%arg0: i32) -> i32 {
    %c0_i32 = arith.constant 0 : i32
    %c0_i32_0 = arith.constant 0 : i32
    return %c0_i32 : i32
  }
}

</mosaic_0001>

<bundles_post_ra>
// kernel: tpu_custom_call.1
= control target key start
LH: loop header
LB: loop body
LE: loop exit
PB: predicated region body
PF: predicated region fallthrough
CT: control target
= control target key end

     0   :  { %7 = vsyncpa [#allocation3], 0  ;;  %s1279_s0 = inlined_call_operand.hbm [shape: f32[2,4,16,16], index: 0, kind: input, shape index: {}]   ;;  %s1280_s1 = inlined_call_operand.hbm [shape: f32[2,4,16,16], index: 1, kind: input, shape index: {}]   ;;  %s1281_s2 = inlined_call_operand.hbm [shape: f32[2], index: 2, kind: output, shape index: {}]  }
   0x1   :  { %9 = vsyncpa [#allocation3 + $0x1], 0 }
   0x2   :  { %10 = vsyncpa [#allocation6], 0 }
   0x3   :  { %12 = vsyncpa [#allocation6 + $0x1], 0 }
   0x4   :  { %13 = vsyncpa [#allocation4], 0  ;;  %s862_s9 = smov 0   ;;  %s864_s10 = smov 0  }
   0x5   :  { %s866_s11 = smov 0   ;;  %s868_s12 = smov 0  }
   0x6 LB: > { %s640_s13 = sadd.s32 4294967295, %s837_s12   ;;  %s882_s14 = sadd.s32 1, %s837_s12   ;;  %s837_s12 = sphi %s868_s12, %s1292_s12   ;;  %s833_s11 = sphi %s866_s11, %s1291_s11   ;;  %s829_s10 = sphi %s864_s10, %s1290_s10   ;;  %s825_s9 = sphi %s862_s9, %s1289_s9  }
   0x7   : > { %s23_s15 = ssub.s32 %s837_s12, %s882_s14  ;;  %s26_s16 = sadd.s32 1, %s833_s11 }
   0x8   : > { %p24_p0 = scmp.eq.s32.totalorder %s23_s15, 0  ;;  %p33_p1 = scmp.ne.s32.totalorder %s833_s11, %s829_s10 }
   0x9   : > { %p34_p2 = scmp.eq.s32.totalorder %s837_s12, 0  ;;  %p39_p3 = scmp.ne.s32.totalorder %s829_s10, %s825_s9 }
   0xa   : > { %s892_s17 = scalar_select %p24_p0, %s833_s11, %s26_s16  }
   0xb   : > { %p35_p4 = por %p34_p2, %p33_p1  ;;  %p40_p5 = scmp.eq.s32.totalorder %s640_s13, 0 }
   0xc   : > { %p674_p6 = scmp.lt.s32.totalorder %s837_s12, 2  ;;  %s902_s19 = sand.u32 1, %s833_s11  }
   0xd   : > { %p897_p7 = por %p40_p5, %p39_p3  ;;  %s643_s20 = sshll.u32 %s902_s19, 6 }
   0xe   : > { %s644_s21 = sshll.u32 %s837_s12, 7  ;;  %s114_s25 = scalar_lea.vmem [#allocation2], %s643_s20 }
   0xf   : > { %s1283_s18 = scalar_select %p897_p7, 1, 0 }
  0x10   : > { %s911_s24 = scalar_lea.hbm %s1279_s0, %s644_s21  ;;  %s120_s26 = sshll.u32 %s114_s25, 4  ;;  %s915_s26 = int_to_ptr.vmem [resolvable:$true] %s120_s26 }
  0x11   : > { %p917_p8 = pnand %p674_p6, %p35_p4  ;;  %s111_s28 = scalar_lea.sflag [#allocation3], %s902_s19 }
  0x12   : > { %s723_s29 = scalar_lea.hbm %s911_s24, 1024  ;;  %s728_s4 = scalar_lea.hbm %s1279_s0, 2048 }
  0x13   : > { %p724_p9 = scmp.ne.s32.totalorder %s911_s24, %s723_s29  ;;  %p725_p10 = pneg %p917_p8 }
  0x14   : > { %p729_p13 = scmp.lt.u32.totalorder %s911_s24, %s1279_s0  ;;  %p730_p0 = scmp.lt.u32.totalorder %s728_s4, %s723_s29 }
  0x15   : > { %p726_p11 = pnand %p725_p10, %p724_p9  ;;  %p732_p2 = scmp.lt.u32.totalorder %s723_s29, %s911_s24 }
  0x16   : > { %p731_p1 = por %p730_p0, %p729_p13 }
  0x17   : > { %p727_p12 = pneg %p726_p11 }
  0x18   : > { %p733_p3 = por %p732_p2, %p731_p1 }
  0x1a   : > { %p734_p4 = pnand %p733_p3, %p727_p12 }
  0x1c   : > { %737 = shalt.err (!%p734_p4)
}
  0x1d   : > { %s738_s7 = scalar_lea.vmem %s915_s26, 1024  ;;  %s839_s8 = smov [#allocation2]  }
  0x1e   : > { %p739_p5 = scmp.ne.s32.totalorder %s915_s26, %s738_s7  ;;  %s743_s9 = sshll.u32 %s839_s8, 4  ;;  %s744_s9 = int_to_ptr.vmem [resolvable:$false] %s743_s9 }
  0x1f   : > { %s745_s15 = scalar_lea.vmem %s744_s9, 2048  ;;  %p746_p11 = scmp.lt.s32.totalorder %s915_s26, %s744_s9 }
  0x20   : > { %p741_p6 = pnand %p739_p5, %p725_p10  ;;  %p747_p13 = scmp.lt.s32.totalorder %s745_s15, %s738_s7 }
  0x22   : > { %p742_p9 = pneg %p741_p6  ;;  %p748_p0 = por %p747_p13, %p746_p11 }
  0x24   : > { %p749_p1 = pnand %p748_p0, %p742_p9 }
  0x26   : > { %752 = shalt.err (!%p749_p1)
}
  0x27   : > { %s840_s16 = smov 256   ;;  %s841_s22 = smov 128  }
  0x28   : > { %s842_s23 = smov 8   ;;  %p647_p12 = scmp.ge.s32.totalorder %s837_s12, 1 }
  0x29   : > { %670 = dma.hbm_to_vmem [thread:$0]  (!%p917_p8), %s911_s24, 1024, %s915_s26, %s111_s28, %s840_s16, %s841_s22, %s842_s23  }
  0x2a   : > { %p148_p2 = scmp.lt.s32.totalorder %s837_s12, 3  ;;  %s963_s3 = scalar_lea.hbm %s1280_s1, %s644_s21 }
  0x2b   : > { %s134_s4 = scalar_lea.vmem [#allocation5], %s643_s20  ;;  %s131_s24 = scalar_lea.sflag [#allocation6], %s902_s19 }
  0x2c   : > { %p954_p3 = pnand %p647_p12, %p148_p2  ;;  %s140_s5 = sshll.u32 %s134_s4, 4  ;;  %s967_s5 = int_to_ptr.vmem [resolvable:$true] %s140_s5 }
  0x2d   : > { %s753_s26 = scalar_lea.hbm %s963_s3, 1024  ;;  %s758_s21 = scalar_lea.hbm %s1280_s1, 2048 }
  0x2e   : > { %p754_p4 = scmp.ne.s32.totalorder %s963_s3, %s753_s26  ;;  %p759_p9 = scmp.lt.u32.totalorder %s963_s3, %s1280_s1 }
  0x2f   : > { %p760_p11 = scmp.lt.u32.totalorder %s758_s21, %s753_s26  ;;  %p762_p0 = scmp.lt.u32.totalorder %s753_s26, %s963_s3 }
  0x30   : > { %p756_p5 = pnand %p754_p4, %p725_p10 }
  0x31   : > { %p761_p13 = por %p760_p11, %p759_p9 }
  0x32   : > { %p757_p6 = pneg %p756_p5 }
  0x33   : > { %p763_p1 = por %p762_p0, %p761_p13 }
  0x35   : > { %p764_p12 = pnand %p763_p1, %p757_p6 }
  0x37   : > { %767 = shalt.err (!%p764_p12)
}
  0x38   : > { %s768_s20 = scalar_lea.vmem %s967_s5, 1024  ;;  %s843_s9 = smov [#allocation5]  }
  0x39   : > { %p769_p2 = scmp.ne.s32.totalorder %s967_s5, %s768_s20  ;;  %s773_s15 = sshll.u32 %s843_s9, 4  ;;  %s774_s15 = int_to_ptr.vmem [resolvable:$false] %s773_s15 }
  0x3a   : > { %s775_s29 = scalar_lea.vmem %s774_s15, 2048  ;;  %p776_p7 = scmp.lt.s32.totalorder %s967_s5, %s774_s15 }
  0x3b   : > { %p771_p4 = pnand %p769_p2, %p725_p10  ;;  %p777_p9 = scmp.lt.s32.totalorder %s775_s29, %s768_s20 }
  0x3d   : > { %p772_p5 = pneg %p771_p4  ;;  %p778_p11 = por %p777_p9, %p776_p7 }
  0x3f   : > { %p779_p13 = pnand %p778_p11, %p772_p5 }
  0x41   : > { %782 = shalt.err (!%p779_p13)
}
  0x42   : > { %673 = dma.hbm_to_vmem [thread:$0]  (!%p917_p8), %s963_s3, 1024, %s967_s5, %s131_s24, %s840_s16, %s841_s22, %s842_s23  }
  0x43   : > { %152 = sbr.rel (%p954_p3) target bundleno = 505 (0x1f9), region = 28  ;;  %s154_s30 = sand.u32 (!%p954_p3), 1, %s829_s10  }
  0x44   : > { %s648_s4 = sshll.u32 (!%p954_p3), %s154_s30, 6  ;;  %s155_s26 = scalar_lea.sflag (!%p954_p3), [#allocation3], %s154_s30 }
  0x45   : > { %s1001_s28 = scalar_lea.vmem (!%p954_p3), [#allocation2], %s648_s4  ;;  %p1286_p7 = scmp.ne.s32.totalorder (!%p954_p3), %s1283_s18, 0 }
  0x4a   : > { %812 = dma.done.wait (%p1286_p7), %s155_s26, 1024  }
  0x4b   : > { %814 = vsyncadd (%p1286_p7), %s155_s26, 4294966272  ;;  %s164_s19 = scalar_lea.sflag [#allocation6], %s154_s30  ;;  %s1007_s27 = scalar_lea.vmem [#allocation5], %s648_s4 }
  0x4c   : > { %816 = dma.done.wait (%p1286_p7), %s164_s19, 1024  }
  0x4d   : > { %818 = vsyncadd (%p1286_p7), %s164_s19, 4294966272  ;;  %v1014_v0 = vld [vmem:[%s1001_s28] sm:$0xff]  ;;  %s844_s16 = smov 15   ;;  %s845_s22 = smov 127   ;;  %v1021_v1 = vld [vmem:[%s1001_s28 + $0x8] sm:$0xff]  ;;  %vm264_vm0 = vcmask 121856  }
  0x4e   : > { %240 = vrot.lane.b32.xlu1 %v1014_v0, %s844_s16  ;;  %216 = vrot.lane.b32.xlu0 %v1014_v0, %s845_s22  ;;  %v197_v2 = vld [vmem:[%s1007_s27 + $0x8] sm:$0xff]  ;;  %v196_v3 = vld [vmem:[%s1007_s27] sm:$0xff]  ;;  %vm330_vm1 = vcmask 130048   ;;  %s655_s18 = scalar_lea.smem [#allocation7], %s837_s12  ;;  %p675_p8 = scmp.eq.s32.totalorder %s640_s13, 1 }
  0x4f   : > { %v1034_v4 = vld [vmem:[%s1001_s28 + $0x10] sm:$0xff]  ;;  %v191_v6 = vld [vmem:[%s1001_s28 + $0x18] sm:$0xff]  ;;  %v1054_v8 = vld [vmem:[%s1001_s28 + $0x28] sm:$0xff]  ;;  %s656_s23 = scalar_lea.smem %s655_s18, 4294967295 [#allocation7]  ;;  %s783_s24 = scalar_lea.hbm %s1281_s2, 16 }
  0x50   : > { %v198_v5 = vld [vmem:[%s1007_s27 + $0x10] sm:$0xff]  ;;  %v1047_v7 = vld [vmem:[%s1007_s27 + $0x18] sm:$0xff]  ;;  %v1057_v9 = vld [vmem:[%s1001_s28 + $0x20] sm:$0xff]  ;;  %p784_p10 = scmp.ne.s32.totalorder %s1281_s2, %s783_s24  ;;  %p789_p0 = scmp.lt.u32.totalorder %s783_s24, %s1281_s2 }
  0x51   : > { %v1068_v10 = vld [vmem:[%s1007_s27 + $0x28] sm:$0xff]  ;;  %v1071_v11 = vld [vmem:[%s1007_s27 + $0x20] sm:$0xff]  ;;  %v1082_v12 = vld [vmem:[%s1001_s28 + $0x30] sm:$0xff] }
  0x52   : > { %242 = vrot.lane.b32.xlu1 %v1021_v1, %s844_s16  ;;  %218 = vrot.lane.b32.xlu0 %v1021_v1, %s845_s22  ;;  %v1089_v13 = vld [vmem:[%s1007_s27 + $0x30] sm:$0xff]  ;;  %v1096_v14 = vld [vmem:[%s1001_s28 + $0x38] sm:$0xff]  ;;  %p785_p3 = pnand %p784_p10, %p675_p8 }
  0x53   : > { %v1103_v15 = vld [vmem:[%s1007_s27 + $0x38] sm:$0xff] }
  0x54   : > { %p786_p6 = pneg %p785_p3 }
  0x56   : > { %367 = vrot.lane.b32.xlu1 %v197_v2, %s845_s22  ;;  %365 = vrot.lane.b32.xlu0 %v196_v3, %s845_s22  ;;  %p791_p1 = pnand %p789_p0, %p786_p6 }
  0x5a   : > { %391 = vrot.lane.b32.xlu1 %v197_v2, %s844_s16  ;;  %389 = vrot.lane.b32.xlu0 %v196_v3, %s844_s16 }
  0x5e   : > { %244 = vrot.lane.b32.xlu1 %v1034_v4, %s844_s16  ;;  %220 = vrot.lane.b32.xlu0 %v1034_v4, %s845_s22 }
  0x62   : > { %393 = vrot.lane.b32.xlu1 %v198_v5, %s844_s16  ;;  %369 = vrot.lane.b32.xlu0 %v198_v5, %s845_s22 }
  0x66   : > { %246 = vrot.lane.b32.xlu1 %v191_v6, %s844_s16  ;;  %222 = vrot.lane.b32.xlu0 %v191_v6, %s845_s22 }
  0x6a   : > { %395 = vrot.lane.b32.xlu1 %v1047_v7, %s844_s16  ;;  %371 = vrot.lane.b32.xlu0 %v1047_v7, %s845_s22 }
  0x6e   : > { %226 = vrot.lane.b32.xlu1 %v1054_v8, %s845_s22  ;;  %224 = vrot.lane.b32.xlu0 %v1057_v9, %s845_s22 }
  0x72   : > { %250 = vrot.lane.b32.xlu1 %v1054_v8, %s844_s16  ;;  %248 = vrot.lane.b32.xlu0 %v1057_v9, %s844_s16 }
  0x76   : > { %375 = vrot.lane.b32.xlu1 %v1068_v10, %s845_s22  ;;  %373 = vrot.lane.b32.xlu0 %v1071_v11, %s845_s22 }
  0x7a   : > { %399 = vrot.lane.b32.xlu1 %v1068_v10, %s844_s16  ;;  %397 = vrot.lane.b32.xlu0 %v1071_v11, %s844_s16 }
  0x7e   : > { %252 = vrot.lane.b32.xlu1 %v1082_v12, %s844_s16  ;;  %228 = vrot.lane.b32.xlu0 %v1082_v12, %s845_s22 }
  0x82   : > { %401 = vrot.lane.b32.xlu1 %v1089_v13, %s844_s16  ;;  %377 = vrot.lane.b32.xlu0 %v1089_v13, %s845_s22 }
  0x86   : > { %254 = vrot.lane.b32.xlu1 %v1096_v14, %s844_s16  ;;  %230 = vrot.lane.b32.xlu0 %v1096_v14, %s845_s22 }
  0x8a   : > { %403 = vrot.lane.b32.xlu1 %v1103_v15, %s844_s16  ;;  %379 = vrot.lane.b32.xlu0 %v1103_v15, %s845_s22 }
  0xc0   : > { %v241_v16 = vpop.permute.xlu1 %240  ;;  %v217_v17 = vpop.permute.xlu0 %216 }
  0xc1   : > { %v265_v31 = vsel %vm264_vm0, %v217_v17, %v241_v16 }
  0xc2   : > { %v273_v38 = vmax.f32 %v1014_v0, %v265_v31 }
  0xc4   : > { %v243_v18 = vpop.permute.xlu1 %242  ;;  %v219_v19 = vpop.permute.xlu0 %218  ;;  %v289_v48 = vrot.slane %v273_v38, 1 }
  0xc5   : > { %v266_v28 = vsel %vm264_vm0, %v219_v19, %v243_v18 }
  0xc6   : > { %v274_v36 = vmax.f32 %v1021_v1, %v266_v28  ;;  %v1129_v59 = vmax.f32 %v273_v38, %v289_v48 }
  0xc8   : > { %v368_v20 = vpop.permute.xlu1 %367  ;;  %v366_v21 = vpop.permute.xlu0 %365  ;;  %v290_v45 = vrot.slane %v274_v36, 1 }
  0xca   : > { %v1125_v56 = vmax.f32 %v274_v36, %v290_v45 }
  0xcc   : > { %v392_v22 = vpop.permute.xlu1 %391  ;;  %v390_v23 = vpop.permute.xlu0 %389 }
  0xcd   : > { %v414_v26 = vsel %vm264_vm0, %v368_v20, %v392_v22  ;;  %v413_v27 = vsel %vm264_vm0, %v366_v21, %v390_v23 }
  0xce   : > { %v422_v32 = vmax.f32 %v197_v2, %v414_v26  ;;  %v421_v33 = vmax.f32 %v196_v3, %v413_v27  ;;  %v323_v3 = vmul.f32 %v1125_v56, %v1125_v56 }
  0xd0   : > { %v245_v24 = vpop.permute.xlu1 %244  ;;  %v221_v25 = vpop.permute.xlu0 %220  ;;  %v438_v41 = vrot.slane %v422_v32, 1  ;;  %v437_v42 = vrot.slane %v421_v33, 1  ;;  %v332_v21 = vsel %vm330_vm1, %v323_v3, 0.0 }
  0xd1   : > { %v267_v35 = vsel %vm264_vm0, %v221_v25, %v245_v24 }
  0xd2   : > { %v275_v43 = vmax.f32 %v1034_v4, %v267_v35  ;;  %v1119_v51 = vmax.f32 %v422_v32, %v438_v41  ;;  %v1121_v52 = vmax.f32 %v421_v33, %v437_v42 }
  0xd4   : > { %v394_v29 = vpop.permute.xlu1 %393  ;;  %v370_v30 = vpop.permute.xlu0 %369  ;;  %v291_v53 = vrot.slane %v275_v43, 1  ;;  %v470_v63 = vmul.f32 %v1119_v51, %v1119_v51  ;;  %v469_v0 = vmul.f32 %v1121_v52, %v1121_v52 }
  0xd5   : > { %v415_v34 = vsel %vm264_vm0, %v370_v30, %v394_v29 }
  0xd6   : > { %v423_v37 = vmax.f32 %v198_v5, %v415_v34  ;;  %v1135_v1 = vmax.f32 %v275_v43, %v291_v53  ;;  %v478_v17 = vsel %vm330_vm1, %v470_v63, 0.0  ;;  %v477_v18 = vsel %vm330_vm1, %v469_v0, 0.0 }
  0xd7   : > { %v479_v24 = vadd.f32 %v478_v17, %v477_v18  ;;  %v204_v17 = vlaneseq }
  0xd8   : > { %v247_v39 = vpop.permute.xlu1 %246  ;;  %v223_v40 = vpop.permute.xlu0 %222  ;;  %v439_v46 = vrot.slane %v423_v37, 1  ;;  %v324_v19 = vmul.f32 %v1135_v1, %v1135_v1 }
  0xd9   : > { %v268_v44 = vsel %vm264_vm0, %v223_v40, %v247_v39 }
  0xda   : > { %v276_v47 = vmax.f32 %v191_v6, %v268_v44  ;;  %v1127_v57 = vmax.f32 %v423_v37, %v439_v46  ;;  %v322_v6 = vmul.f32 %v1129_v59, %v1129_v59  ;;  %v334_v30 = vsel %vm330_vm1, %v324_v19, 0.0 }
  0xdc   : > { %v396_v49 = vpop.permute.xlu1 %395  ;;  %v372_v50 = vpop.permute.xlu0 %371  ;;  %v292_v58 = vrot.slane %v276_v47, 1  ;;  %v471_v4 = vmul.f32 %v1127_v57, %v1127_v57  ;;  %v331_v29 = vsel %vm330_vm1, %v322_v6, 0.0 }
  0xdd   : > { %v416_v54 = vsel %vm264_vm0, %v372_v50, %v396_v49  ;;  %v333_v32 = vadd.f32 %v332_v21, %v331_v29  ;;  %v205_v29 = vshrl.u32 %v204_v17, 7 }
  0xde   : > { %v424_v55 = vmax.f32 %v1047_v7, %v416_v54  ;;  %v1143_v5 = vmax.f32 %v276_v47, %v292_v58  ;;  %v480_v22 = vsel %vm330_vm1, %v471_v4, 0.0 }
  0xdf   : > { %v481_v33 = vadd.f32 %v480_v22, %v479_v24  ;;  %v335_v37 = vadd.f32 %v334_v30, %v333_v32  ;;  %v207_v30 = vand.u32 127, %v204_v17 }
  0xe0   : > { %v440_v60 = vrot.slane %v424_v55, 1  ;;  %v227_v61 = vpop.permute.xlu1 %226  ;;  %v225_v62 = vpop.permute.xlu0 %224  ;;  %v325_v23 = vmul.f32 %v1143_v5, %v1143_v5 }
  0xe2   : > { %v1137_v2 = vmax.f32 %v424_v55, %v440_v60  ;;  %v336_v34 = vsel %vm330_vm1, %v325_v23, 0.0 }
  0xe3   : > { %v337_v43 = vadd.f32 %v336_v34, %v335_v37 }
  0xe4   : > { %v251_v7 = vpop.permute.xlu1 %250  ;;  %v249_v16 = vpop.permute.xlu0 %248  ;;  %v472_v20 = vmul.f32 %v1137_v2, %v1137_v2 }
  0xe5   : > { %v270_v25 = vsel %vm264_vm0, %v227_v61, %v251_v7  ;;  %v269_v26 = vsel %vm264_vm0, %v225_v62, %v249_v16  ;;  %v345_v50 = vmax.f32 %v337_v43, 1e-24 }
  0xe6   : > { %v482_v31 = vsel %vm330_vm1, %v472_v20, 0.0  ;;  %v278_v35 = vmax.f32 %v1054_v8, %v270_v25  ;;  %v277_v36 = vmax.f32 %v1057_v9, %v269_v26 }
  0xe7   : > { %v483_v38 = vadd.f32 %v482_v31, %v481_v33 }
  0xe8   : > { %v376_v27 = vpop.permute.xlu1 %375  ;;  %v374_v28 = vpop.permute.xlu0 %373  ;;  %v294_v44 = vrot.slane %v278_v35, 1  ;;  %v293_v45 = vrot.slane %v277_v36, 1 }
  0xe9   : > { %v491_v46 = vmax.f32 %v483_v38, 1e-24 }
  0xea   : > { %v1171_v54 = vmax.f32 %v278_v35, %v294_v44  ;;  %v1173_v55 = vmax.f32 %v277_v36, %v293_v45 }
  0xeb   : > { %715 = vrsqrt.f32 %v491_v46  ;;  %v513_v46 = vand.u32 1, %v207_v30 }
  0xec   : > { %v400_v39 = vpop.permute.xlu1 %399  ;;  %v398_v40 = vpop.permute.xlu0 %397  ;;  %717 = vrsqrt.f32 %v345_v50  ;;  %v327_v0 = vmul.f32 %v1171_v54, %v1171_v54  ;;  %v326_v3 = vmul.f32 %v1173_v55, %v1173_v55 }
  0xed   : > { %v418_v41 = vsel %vm264_vm0, %v376_v27, %v400_v39  ;;  %v417_v42 = vsel %vm264_vm0, %v374_v28, %v398_v40  ;;  %vm514_vm3 = vcmp.eq.s32.totalorder %v513_v46, 0 }
  0xee   : > { %v426_v47 = vmax.f32 %v1068_v10, %v418_v41  ;;  %v425_v48 = vmax.f32 %v1071_v11, %v417_v42  ;;  %v338_v23 = vsel %vm330_vm1, %v326_v3, 0.0  ;;  %v511_v42 = vand.u32 1, %v205_v29 }
  0xf0   : > { %v253_v49 = vpop.permute.xlu1 %252  ;;  %v229_v8 = vpop.permute.xlu0 %228  ;;  %v442_v58 = vrot.slane %v426_v47, 1  ;;  %v441_v60 = vrot.slane %v425_v48, 1  ;;  %vm512_vm2 = vcmp.eq.s32.totalorder %v511_v42, 0 }
  0xf1   : > { %v271_v9 = vsel %vm264_vm0, %v229_v8, %v253_v49  ;;  %vm1215_vm4 = vmand %vm512_vm2, %vm514_vm3 }
  0xf2   : > { %v279_v53 = vmax.f32 %v1082_v12, %v271_v9  ;;  %v1183_v4 = vmax.f32 %v426_v47, %v442_v58  ;;  %v1185_v6 = vmax.f32 %v425_v48, %v441_v60 }
  0xf4   : > { %v295_v61 = vrot.slane %v279_v53, 1  ;;  %v402_v62 = vpop.permute.xlu1 %401  ;;  %v378_v63 = vpop.permute.xlu0 %377  ;;  %v474_v24 = vmul.f32 %v1183_v4, %v1183_v4  ;;  %v473_v25 = vmul.f32 %v1185_v6, %v1185_v6 }
  0xf5   : > { %v419_v10 = vsel %vm264_vm0, %v378_v63, %v402_v62 }
  0xf6   : > { %v1176_v11 = vmax.f32 %v279_v53, %v295_v61  ;;  %v427_v12 = vmax.f32 %v1089_v13, %v419_v10  ;;  %v339_v13 = vsel %vm330_vm1, %v327_v0, 0.0  ;;  %v485_v38 = vsel %vm330_vm1, %v474_v24, 0.0 }
  0xf7   : > { %v340_v36 = vadd.f32 %v339_v13, %v338_v23  ;;  %v484_v39 = vsel %vm330_vm1, %v473_v25, 0.0 }
  0xf8   : > { %v255_v7 = vpop.permute.xlu1 %254  ;;  %v231_v16 = vpop.permute.xlu0 %230  ;;  %v443_v18 = vrot.slane %v427_v12, 1  ;;  %v328_v20 = vmul.f32 %v1176_v11, %v1176_v11  ;;  %v486_v49 = vadd.f32 %v485_v38, %v484_v39 }
  0xf9   : > { %v272_v19 = vsel %vm264_vm0, %v231_v16, %v255_v7 }
  0xfa   : > { %v280_v21 = vmax.f32 %v1096_v14, %v272_v19  ;;  %v1192_v22 = vmax.f32 %v427_v12, %v443_v18  ;;  %v716_v14 = vpop.eup %715  ;;  %v341_v32 = vsel %vm330_vm1, %v328_v20, 0.0 }
  0xfb   : > { %v718_v37 = vpop.eup %717  ;;  %v342_v43 = vadd.f32 %v341_v32, %v340_v36  ;;  %v495_v44 = vmul.f32 %v716_v14, %v1121_v52  ;;  %v496_v45 = vmul.f32 %v716_v14, %v1119_v51  ;;  %v497_v58 = vmul.f32 %v716_v14, %v1127_v57 }
  0xfc   : > { %v296_v26 = vrot.slane %v280_v21, 1  ;;  %v404_v27 = vpop.permute.xlu1 %403  ;;  %v380_v28 = vpop.permute.xlu0 %379  ;;  %v475_v33 = vmul.f32 %v1192_v22, %v1192_v22  ;;  %v349_v9 = vmul.f32 %v718_v37, %v1129_v59  ;;  %v350_v50 = vmul.f32 %v718_v37, %v1125_v56 }
  0xfd   : > { %v420_v31 = vsel %vm264_vm0, %v380_v28, %v404_v27  ;;  %v351_v10 = vmul.f32 %v718_v37, %v1135_v1  ;;  %v498_v57 = vmul.f32 %v716_v14, %v1137_v2  ;;  %v352_v7 = vmul.f32 %v718_v37, %v1143_v5 }
  0xfe   : > { %v321_v34 = vmax.f32 %v280_v21, %v296_v26  ;;  %v428_v35 = vmax.f32 %v1103_v15, %v420_v31  ;;  %v487_v47 = vsel %vm330_vm1, %v475_v33, 0.0  ;;  %v503_v52 = vsub.f32 %v349_v9, %v495_v44 }
  0xff   : > { %v488_v60 = vadd.f32 %v487_v47, %v486_v49  ;;  %v504_v62 = vsub.f32 %v350_v50, %v496_v45  ;;  %v505_v12 = vsub.f32 %v351_v10, %v497_v58  ;;  %v506_v18 = vsub.f32 %v352_v7, %v498_v57 }
 0x100   : > { %v329_v40 = vmul.f32 %v321_v34, %v321_v34  ;;  %v444_v41 = vrot.slane %v428_v35, 1  ;;  %v516_v59 = vmul.f32 %v503_v52, %v503_v52 }
 0x101   : > { %v517_v3 = vmul.f32 %v504_v62, %v504_v62  ;;  %v518_v16 = vmul.f32 %v505_v12, %v505_v12  ;;  %v519_v2 = vmul.f32 %v506_v18, %v506_v18 }
 0x102   : > { %v343_v48 = vsel %vm330_vm1, %v329_v40, 0.0  ;;  %v468_v15 = vmax.f32 %v428_v35, %v444_v41  ;;  %v526_v17 = vsel %vm1215_vm4, %v516_v59, 0.0 }
 0x103   : > { %v344_v8 = vadd.f32 %v343_v48, %v342_v43  ;;  %v527_v1 = vsel %vm1215_vm4, %v517_v3, 0.0  ;;  %v534_v19 = vsel %vm330_vm1, %v526_v17, 0.0  ;;  %v528_v21 = vsel %vm1215_vm4, %v518_v16, 0.0 }
 0x104   : > { %v476_v53 = vmul.f32 %v468_v15, %v468_v15  ;;  %v535_v20 = vsel %vm330_vm1, %v527_v1, 0.0  ;;  %v537_v5 = vsel %vm330_vm1, %v528_v21, 0.0  ;;  %v529_v32 = vsel %vm1215_vm4, %v519_v2, 0.0 }
 0x105   : > { %v346_v61 = vmax.f32 %v344_v8, 1e-24  ;;  %v536_v23 = vadd.f32 %v535_v20, %v534_v19 }
 0x106   : > { %v489_v51 = vsel %vm330_vm1, %v476_v53, 0.0 }
 0x107   : > { %v490_v63 = vadd.f32 %v489_v51, %v488_v60  ;;  %719 = vrsqrt.f32 %v346_v61  ;;  %v538_v33 = vadd.f32 %v537_v5, %v536_v23 }
 0x109   : > { %v492_v0 = vmax.f32 %v490_v63, 1e-24 }
 0x10b   : > { %721 = vrsqrt.f32 %v492_v0 }
 0x111   : > { %v720_v13 = vpop.eup %719 }
 0x112   : > { %v356_v25 = vmul.f32 %v720_v13, %v321_v34  ;;  %v353_v26 = vmul.f32 %v720_v13, %v1173_v55  ;;  %v354_v27 = vmul.f32 %v720_v13, %v1171_v54  ;;  %v355_v28 = vmul.f32 %v720_v13, %v1176_v11 }
 0x113   : > { %v539_v11 = vsel %vm330_vm1, %v529_v32, 0.0 }
 0x115   : > { %v722_v24 = vpop.eup %721 }
 0x116   : > { %v502_v29 = vmul.f32 %v722_v24, %v468_v15  ;;  %v499_v30 = vmul.f32 %v722_v24, %v1185_v6  ;;  %v500_v31 = vmul.f32 %v722_v24, %v1183_v4  ;;  %v501_v14 = vmul.f32 %v722_v24, %v1192_v22 }
 0x117   : > { %v540_v22 = vadd.f32 %v539_v11, %v538_v33 }
 0x118   : > { %v507_v35 = vsub.f32 %v353_v26, %v499_v30  ;;  %v508_v36 = vsub.f32 %v354_v27, %v500_v31  ;;  %v509_v34 = vsub.f32 %v355_v28, %v501_v14  ;;  %v510_v37 = vsub.f32 %v356_v25, %v502_v29 }
 0x11a   : > { %v520_v55 = vmul.f32 %v507_v35, %v507_v35  ;;  %v521_v38 = vmul.f32 %v508_v36, %v508_v36  ;;  %v522_v54 = vmul.f32 %v509_v34, %v509_v34  ;;  %v523_v39 = vmul.f32 %v510_v37, %v510_v37 }
 0x11c   : > { %v530_v6 = vsel %vm1215_vm4, %v520_v55, 0.0  ;;  %v531_v4 = vsel %vm1215_vm4, %v521_v38, 0.0  ;;  %v532_v41 = vsel %vm1215_vm4, %v522_v54, 0.0  ;;  %v533_v44 = vsel %vm1215_vm4, %v523_v39, 0.0 }
 0x11d   : > { %v541_v40 = vsel %vm330_vm1, %v530_v6, 0.0  ;;  %v543_v43 = vsel %vm330_vm1, %v531_v4, 0.0  ;;  %v545_v46 = vsel %vm330_vm1, %v532_v41, 0.0  ;;  %v547_v48 = vsel %vm330_vm1, %v533_v44, 0.0 }
 0x11e   : > { %v542_v42 = vadd.f32 %v541_v40, %v540_v22 }
 0x120   : > { %v544_v45 = vadd.f32 %v543_v43, %v542_v42 }
 0x122   : > { %v546_v47 = vadd.f32 %v545_v46, %v544_v45 }
 0x124   : > { %v548_v15 = vadd.f32 %v547_v48, %v546_v47 }
 0x126   : > { %549 = vadd.xlane.f32.xlu0 %v548_v15 }
 0x1b3   : > { %v550_v49 = vpop.xlane.xlu0 %549 }
 0x1b4   : > { %v551_v8 = vrot.slane %v550_v49, 4 }
 0x1b6   : > { %v552_v9 = vadd.f32 %v551_v8, %v550_v49 }
 0x1b8   : > { %v553_v50 = vrot.slane %v552_v9, 2 }
 0x1ba   : > { %v554_v53 = vadd.f32 %v553_v50, %v552_v9 }
 0x1bc   : > { %v555_v58 = vrot.slane %v554_v53, 1 }
 0x1be   : > { %v556_v60 = vadd.f32 %v555_v58, %v554_v53 }
 0x1c0   : > { %657 = vpush %v556_v60 }
 0x1f1   : > { %s658_s25 = spop %657 }
 0x1f2   : > { %559 = sst [smem:[%s656_s23]] %s658_s25 }
 0x1f3   : > { %794 = shalt.err (!%p791_p1)
}
 0x1f4   : > { %s846_s12 = smov [#allocation7]  }
 0x1f5   : > { %664 = dma.smem_to_hbm (%p675_p8), %s846_s12, 16, %s1281_s2, [#allocation4]  }
 0x1f6   : > { %820 = dma.done.wait (%p675_p8), [#allocation4], 16  }
 0x1f7   : > { %822 = vsyncadd (%p675_p8), [#allocation4], 4294967280 }
 0x1f8   : > { %573 = sfence }
 0x1f9 PF: > { %p16_p12 = scmp.ge.s32.totalorder %s882_s14, 4   ;;  %s1289_s9 = smov %s829_s10 }
 0x1fa   : > { %s1290_s10 = smov %s833_s11  ;;  %s1291_s11 = smov %s892_s17 }
 0x1fb   : > { %s1292_s12 = smov %s882_s14  ;;  %18 = sbr.rel (!%p16_p12) target bundleno = 6 (0x6), region = 79 }
 0x202   :  { %579 = vsyncpa [#allocation3], 1 }
 0x203   :  { %581 = vsyncpa [#allocation3 + $0x1], 1 }
 0x204   :  { %582 = vsyncpa [#allocation6], 1 }
 0x205   :  { %584 = vsyncpa [#allocation6 + $0x1], 1 }
 0x206   :  { %585 = vsyncpa [#allocation4], 1 }
 0x207   :  { %587 = vsyncpa [#allocation4 + $0x1], 1 }

</bundles_post_ra>
